<compile_context>
chip_gen: v6e
topology: v6e:2x2x1
jax: 0.10.0
libtpu: 0.0.40
codegen_flags: <defaults>
</compile_context>

<pallas_src>
import functools
import math

import jax
import jax.numpy as jnp
from jax.experimental import pallas as pl
from jax.experimental.pallas import tpu as pltpu


def _maxout_kernel(x_ref, o_ref, *, pool_size: int):
    # x_ref: (tile_r, tile_c), o_ref: (tile_r, tile_c // pool_size)
    tile_r, tile_c = x_ref.shape
    groups = tile_c // pool_size
    x = x_ref[...]
    # Group j <- lanes [j*pool, (j+1)*pool); reduce over the pool axis.
    o_ref[...] = jnp.max(x.reshape(tile_r, groups, pool_size), axis=-1)


def _vmem_capacity_bytes() -> int:
    """Best-effort VMEM capacity query; defaults to 128 MiB (v5e/v6e)."""
    try:
        info = pltpu.get_tpu_info()
        cap = getattr(info, "vmem_capacity_bytes", None)
        if cap:
            return int(cap)
    except Exception:
        pass
    return 128 * 2**20


def maxout(x: jax.Array, pool_size: int, *,
           block_bytes: int | None = None,
           min_pallas_bytes: int = 1 << 20) -> jax.Array:
    assert x.shape[-1] % pool_size == 0, (
        f"Wrong input last dim size ({x.shape[-1]}) for Maxout({pool_size})")
    lead = x.shape[:-1]
    d = x.shape[-1]
    g = d // pool_size

    if pool_size == 1:
        return x
    if x.size == 0:
        return jnp.zeros((*lead, g), dtype=x.dtype)

    itemsize = jnp.dtype(x.dtype).itemsize
    total_bytes = x.size * itemsize
    if total_bytes < min_pallas_bytes:
        # Tiny tensor: pallas_call launch + per-step overhead dominates; the
        # fused XLA reduction is strictly faster.
        return jnp.max(x.reshape(*lead, g, pool_size), axis=-1)

    n = math.prod(lead) if lead else 1
    sub = max(8, 32 // itemsize)          # sublane packing multiple per dtype

    vmem_cap = _vmem_capacity_bytes()
    small_vmem = vmem_cap <= 64 * 2**20   # v7x-like: 64 MiB VMEM per TensorCore
    if block_bytes is None:
        block_bytes = (6 << 20) if small_vmem else (12 << 20)

    # ---- choose a (rows, cols) view of the flat data -------------------------
    # Fold k original rows into one wide row (k | n): groups stay contiguous,
    # so semantics are preserved and the output row width k*g becomes a healthy
    # multiple of 128 lanes for dense, unmasked stores.
    target_out_lanes = 2048
    max_row_elems = 1 << 16
    max_k = min(n, max(1, max_row_elems // d))
    best_k, best_key = 1, None
    for cand in range(1, max_k + 1):
        if n % cand:
            continue
        lanes = cand * g
        if lanes % 128 == 0 and lanes >= target_out_lanes:
            key = (3, -lanes)          # lane-aligned & big enough: smallest such
        elif lanes % 128 == 0:
            key = (2, lanes)           # lane-aligned: bigger is better
        elif lanes >= 128:
            key = (1, lanes)           # at least one full vreg of lanes
        else:
            key = (0, lanes)           # last resort: widest available
        if best_key is None or key > best_key:
            best_k, best_key = cand, key
    k = best_k

    rows = n // k
    cols = k * d
    out_cols = cols // pool_size

    x2 = x.reshape(rows, cols)            # free: contiguous re-view, no copy

    # ---- tile sizes -----------------------------------------------------------
    if cols * itemsize * sub <= block_bytes:
        # Whole (folded) rows per block; pick as many rows as fit the budget.
        tile_c = cols
        tile_r = max(sub, (block_bytes // (cols * itemsize)) // sub * sub)
        tile_r = min(rows, tile_r)
        if small_vmem and rows > sub:
            # v7x: the ("parallel","parallel") grid is sharded across 2 TCs and
            # needs a few steps for DMA/compute overlap; keep >= ~8 grid steps.
            cap = max(sub, pl.cdiv(pl.cdiv(rows, 8), sub) * sub)
            tile_r = min(tile_r, cap)
    else:
        # Very wide folded rows: tile the feature axis too.  Width is a
        # multiple of 128*pool so groups never split and the output tile stays
        # a multiple of 128 lanes.  Taller blocks (64 rows) cut the number of
        # per-row strided DMA descriptors and give the reduction more sublanes.
        tile_r = min(rows, 64)
        unit = 128 * pool_size
        tile_c = max(unit, (block_bytes // (tile_r * itemsize)) // unit * unit)
        tile_c = min(tile_c, pl.cdiv(cols, unit) * unit)

    # Invariant: pool groups never straddle a column-block boundary, so garbage
    # lanes of partial blocks only ever feed dropped (out-of-bounds) outputs.
    assert cols % pool_size == 0 and tile_c % pool_size == 0, (
        "pool groups must not straddle column-block boundaries")

    grid = (pl.cdiv(rows, tile_r), pl.cdiv(cols, tile_c))

    in_block_bytes = tile_r * tile_c * itemsize
    out_block_bytes = tile_r * (tile_c // pool_size) * itemsize
    if small_vmem:
        # v7x: 64 MiB/TC.  Budget double-buffered in/out PLUS the in-kernel
        # reshape relayout temp (~ one input tile), and stay well under 64 MiB.
        vmem_limit = int(min(48 * 2**20,
                             max(32 * 2**20,
                                 3 * in_block_bytes + 2 * out_block_bytes)))
    else:
        # v5e/v6e: 128 MiB VMEM.  v5e's scoped default is only 16 MiB, so the
        # explicit limit is doing real work here.
        vmem_limit = int(min(96 * 2**20,
                             max(32 * 2**20,
                                 4 * (in_block_bytes + out_block_bytes))))

    cost = pl.CostEstimate(
        flops=int(n) * int(d),            # comparisons, advisory only
        transcendentals=0,
        bytes_accessed=int(n) * (int(d) + int(g)) * itemsize,
    )

    # Note: on v5e/v6e, if profiling shows exposed DMA gaps in the column-tiled
    # branch, pipeline_mode=pl.Buffered(3) on the input BlockSpec is the next
    # lever (128 MiB VMEM has the headroom); keep depth 2 on v7x.
    out2 = pl.pallas_call(
        functools.partial(_maxout_kernel, pool_size=pool_size),
        out_shape=jax.ShapeDtypeStruct((rows, out_cols), x.dtype),
        grid_spec=pltpu.PrefetchScalarGridSpec(
            num_scalar_prefetch=0,
            grid=grid,
            in_specs=[pl.BlockSpec((tile_r, tile_c), lambda i, j: (i, j))],
            out_specs=pl.BlockSpec((tile_r, tile_c // pool_size),
                                   lambda i, j: (i, j)),
        ),
        compiler_params=pltpu.CompilerParams(
            dimension_semantics=("parallel", "parallel"),
            vmem_limit_bytes=vmem_limit,
        ),
        cost_estimate=cost,
    )(x2)

    return out2.reshape(*lead, g)


if __name__ == "__main__":
    key = jax.random.PRNGKey(0)
    ks = jax.random.split(key, 4)

    def ref_maxout(a, p):
        gg = a.shape[-1] // p
        return jnp.max(a.reshape(*a.shape[:-1], gg, p), axis=-1)

    # 1) Generator hidden activations (batch=2, seq=8, hidden*pool=32), pool=4.
    #    Tiny -> exercises the jnp fast path.
    pool_size = 4
    x1 = jax.random.normal(ks[0], (2, 8, 32), dtype=jnp.float32)
    o1 = jax.block_until_ready(maxout(x1, pool_size))
    assert o1.shape == (2, 8, 8), o1.shape
    assert jnp.allclose(o1, ref_maxout(x1, pool_size)), "mismatch (case 1)"

    # 2) Awkward small sizes (odd leading dims, g < 128), forced through the
    #    Pallas path to validate edge/partial-block handling.
    x2 = jax.random.normal(ks[1], (3, 7, 16), dtype=jnp.float32)
    o2 = jax.block_until_ready(maxout(x2, 4, min_pallas_bytes=0))
    assert o2.shape == (3, 7, 4), o2.shape
    assert jnp.allclose(o2, ref_maxout(x2, 4)), "mismatch (case 2)"

    # 3) Moderate size (4 MiB) that naturally takes the Pallas path.
    x3 = jax.random.normal(ks[2], (16, 32, 2048), dtype=jnp.float32)
    o3 = jax.block_until_ready(maxout(x3, 4))
    assert o3.shape == (16, 32, 512), o3.shape
    assert jnp.allclose(o3, ref_maxout(x3, 4)), "mismatch (case 3)"

    # 4) bf16, prime-ish leading dims, g < 128 -> exercises the fold search,
    #    forced through the Pallas path.
    x4 = jax.random.normal(ks[3], (257, 3, 64), dtype=jnp.bfloat16)
    o4 = jax.block_until_ready(maxout(x4, 8, min_pallas_bytes=0))
    assert o4.shape == (257, 3, 8), o4.shape
    assert jnp.array_equal(o4, ref_maxout(x4, 8)), "mismatch (case 4)"

    print("KERNEL_OK")
</pallas_src>

<mosaic_0001>
module attributes {stable_mosaic.version = 11 : i64} {
  func.func @_maxout_kernel(%arg0: i32, %arg1: i32, %arg2: memref<1x336xf32, #tpu.memory_space<vmem>>, %arg3: memref<1x84xf32, #tpu.memory_space<vmem>>) attributes {dimension_semantics = [#tpu.dimension_semantics<parallel>, #tpu.dimension_semantics<parallel>], iteration_bounds = array<i64: 1, 1>, scalar_prefetch = 0 : i64, scratch_operands = 0 : i64, tpu.core_type = #tpu.core_type<tc>, window_params = [{transform_indices = @transform_0, window_bounds = array<i64: 1, 336>}, {transform_indices = @transform_1, window_bounds = array<i64: 1, 84>}]} {
    %c0 = arith.constant 0 : index
    %c0_0 = arith.constant 0 : index
    %0 = vector.load %arg2[%c0, %c0_0] : memref<1x336xf32, #tpu.memory_space<vmem>>, vector<1x336xf32>
    %1 = vector.shape_cast %0 : vector<1x336xf32> to vector<1x84x4xf32>
    %cst = arith.constant dense<0xFF800000> : vector<1x84xf32>
    %2 = vector.multi_reduction <maximumf>, %1, %cst [2] : vector<1x84x4xf32> to vector<1x84xf32>
    %c0_1 = arith.constant 0 : index
    %c0_2 = arith.constant 0 : index
    %3 = vector.load %arg3[%c0_1, %c0_2] : memref<1x84xf32, #tpu.memory_space<vmem>>, vector<1x84xf32>
    tpu.vector_store %arg3[%c0_1, %c0_2], %2 {strides = array<i32>} : memref<1x84xf32, #tpu.memory_space<vmem>>, vector<1x84xf32>,
    return
  }
  func.func @transform_0(%arg0: i32, %arg1: i32) -> (i32, i32) {
    %c0_i32 = arith.constant 0 : i32
    return %arg0, %arg1 : i32, i32
  }
  func.func @transform_1(%arg0: i32, %arg1: i32) -> (i32, i32) {
    %c0_i32 = arith.constant 0 : i32
    return %arg0, %arg1 : i32, i32
  }
}

</mosaic_0001>

<bundles_post_ra>
// kernel: tpu_custom_call.1
= control target key start
LH: loop header
LB: loop body
LE: loop exit
PB: predicated region body
PF: predicated region fallthrough
CT: control target
= control target key end

     0   :  { %6 = vsyncpa [#allocation3], 0  ;;  %s1177_s0 = inlined_call_operand.hbm [shape: f32[1,336], index: 0, kind: input, shape index: {}]   ;;  %s1178_s1 = inlined_call_operand.hbm [shape: f32[1,84], index: 1, kind: output, shape index: {}]  }
   0x1   :  { %7 = vsyncpa [#allocation4], 0  ;;  %s880_s6 = smov [#allocation2]  }
   0x2   :  { %s14_s7 = sshll.u32 %s880_s6, 4  ;;  %s15_s7 = int_to_ptr.vmem [resolvable:$true] %s14_s7 }
   0x3   :  { %s844_s8 = scalar_lea.vmem %s15_s7, 48  ;;  %s848_s9 = scalar_lea.vmem %s15_s7, 64 }
   0x4   :  { %p845_p0 = scmp.ne.s32.totalorder %s15_s7, %s844_s8  ;;  %p849_p1 = scmp.lt.s32.totalorder %s15_s7, %s15_s7 }
   0x5   :  { %p850_p2 = scmp.lt.s32.totalorder %s848_s9, %s844_s8 }
   0x7   :  { %p851_p3 = por %p850_p2, %p849_p1 }
   0x9   :  { %p852_p4 = pnand %p851_p3, %p845_p0 }
   0xb   :  { %855 = shalt.err (!%p852_p4)
}
   0xc   :  { %17 = dma.hbm_to_vmem [thread:$0]  %s1177_s0, 48, %s15_s7, [#allocation3]  }
   0xd   :  { %876 = dma.done.wait [#allocation3], 48  }
   0xe   :  { %877 = vsyncadd [#allocation3], 4294967248  ;;  %v927_v0 = vld [vmem:[#allocation2] sm:$0x7]  ;;  %s881_s12 = smov 124   ;;  %s882_s13 = smov 116   ;;  %v144_v5 = vlaneseq }
   0xf   :  { %24 = vrot.lane.b32.xlu0 %v927_v0, %s881_s12  ;;  %30 = vrot.lane.b32.xlu1 %v927_v0, %s882_s13  ;;  %s883_s14 = smov 120   ;;  %s884_s15 = smov 112   ;;  %v912_v3 = vmov 1966171168   ;;  %vm662_vm0 = vcmask 31744   ;;  %v23_v31 = vrot.slane %v927_v0, 1 }
  0x10   :  { %s885_s16 = smov 108   ;;  %s886_s0 = smov 104   ;;  %v142_v4 = vunpack.c.l.s4 %v912_v3  ;;  %v963_v9 = vshrl.u32 %v144_v5, 7  ;;  %v117_v32 = vrot.slane %v927_v0, 2  ;;  %vm693_vm1 = vcmask 27648  }
  0x11   :  { %s887_s17 = smov 100   ;;  %s888_s18 = smov 96   ;;  %vm719_vm2 = vcmask 130112   ;;  %vm726_vm3 = vcmask 195712   ;;  %vm733_vm4 = vcmask 261312   ;;  %vm740_vm5 = vcmask 326912  }
  0x12   :  { %s889_s19 = smov 92   ;;  %s890_s20 = smov 88   ;;  %v143_v8 = vunpack.c.0.s8 %v142_v4  ;;  %vm747_vm6 = vcmask 392512   ;;  %vm754_vm7 = vcmask 458112   ;;  %vm761_vm8 = vcmask 523712  }
  0x13   :  { %27 = vrot.lane.b32.xlu0 %v927_v0, %s883_s14  ;;  %33 = vrot.lane.b32.xlu1 %v927_v0, %s884_s15  ;;  %s891_s21 = smov 84   ;;  %s892_s22 = smov 80   ;;  %vm768_vm9 = vcmask 589312   ;;  %vm775_vm10 = vcmask 654912   ;;  %vm782_vm11 = vcmask 720512   ;;  %vm785_vm12 = vcmask 679936  }
  0x14   :  { %s893_s23 = smov 76   ;;  %s894_s24 = smov 72   ;;  %v970_v13 = vsub.s32 %v143_v8, %v963_v9 }
  0x15   :  { %s895_s25 = smov 68   ;;  %s896_s26 = smov 64  }
  0x16   :  { %s897_s27 = smov 60   ;;  %s898_s28 = smov 56  }
  0x17   :  { %36 = vrot.lane.b32.xlu0 %v927_v0, %s885_s16  ;;  %39 = vrot.lane.b32.xlu1 %v927_v0, %s886_s0  ;;  %s899_s29 = smov 52   ;;  %s900_s30 = smov 48  }
  0x18   :  { %s901_s2 = smov 44   ;;  %s902_s3 = smov 40  }
  0x19   :  { %s903_s4 = smov 36   ;;  %s904_s5 = smov 32  }
  0x1a   :  { %s905_s6 = smov 28   ;;  %s906_s7 = smov 24  }
  0x1b   :  { %42 = vrot.lane.b32.xlu0 %v927_v0, %s887_s17  ;;  %45 = vrot.lane.b32.xlu1 %v927_v0, %s888_s18  ;;  %s907_s8 = smov 20   ;;  %s908_s9 = smov 16  }
  0x1c   :  { %s909_s10 = smov 12   ;;  %s910_s11 = smov 8  }
  0x1d   :  { %s911_s12 = smov 4   ;;  %s913_s13 = smov [#allocation5]  }
  0x1e   :  { %s793_s14 = sshll.u32 %s913_s13, 4  ;;  %s794_s14 = int_to_ptr.vmem [resolvable:$true] %s793_s14 }
  0x1f   :  { %48 = vrot.lane.b32.xlu0 %v927_v0, %s889_s19  ;;  %51 = vrot.lane.b32.xlu1 %v927_v0, %s890_s20  ;;  %s856_s15 = scalar_lea.vmem %s794_s14, 16  ;;  %s860_s16 = scalar_lea.vmem %s794_s14, 32 }
  0x20   :  { %p857_p5 = scmp.ne.s32.totalorder %s794_s14, %s856_s15  ;;  %p861_p6 = scmp.lt.s32.totalorder %s794_s14, %s794_s14 }
  0x21   :  { %p862_p7 = scmp.lt.s32.totalorder %s860_s16, %s856_s15 }
  0x23   :  { %54 = vrot.lane.b32.xlu0 %v927_v0, %s891_s21  ;;  %57 = vrot.lane.b32.xlu1 %v927_v0, %s892_s22  ;;  %p863_p8 = por %p862_p7, %p861_p6 }
  0x25   :  { %p864_p9 = pnand %p863_p8, %p857_p5 }
  0x27   :  { %60 = vrot.lane.b32.xlu0 %v927_v0, %s893_s23  ;;  %63 = vrot.lane.b32.xlu1 %v927_v0, %s894_s24 }
  0x2b   :  { %66 = vrot.lane.b32.xlu0 %v927_v0, %s895_s25  ;;  %69 = vrot.lane.b32.xlu1 %v927_v0, %s896_s26 }
  0x2f   :  { %72 = vrot.lane.b32.xlu0 %v927_v0, %s897_s27  ;;  %75 = vrot.lane.b32.xlu1 %v927_v0, %s898_s28 }
  0x33   :  { %78 = vrot.lane.b32.xlu0 %v927_v0, %s899_s29  ;;  %81 = vrot.lane.b32.xlu1 %v927_v0, %s900_s30 }
  0x37   :  { %84 = vrot.lane.b32.xlu0 %v927_v0, %s901_s2  ;;  %87 = vrot.lane.b32.xlu1 %v927_v0, %s902_s3 }
  0x3b   :  { %90 = vrot.lane.b32.xlu0 %v927_v0, %s903_s4  ;;  %93 = vrot.lane.b32.xlu1 %v927_v0, %s904_s5 }
  0x3f   :  { %96 = vrot.lane.b32.xlu0 %v927_v0, %s905_s6  ;;  %99 = vrot.lane.b32.xlu1 %v927_v0, %s906_s7 }
  0x43   :  { %102 = vrot.lane.b32.xlu0 %v927_v0, %s907_s8  ;;  %105 = vrot.lane.b32.xlu1 %v927_v0, %s908_s9 }
  0x47   :  { %108 = vrot.lane.b32.xlu0 %v927_v0, %s909_s10  ;;  %111 = vrot.lane.b32.xlu1 %v927_v0, %s910_s11 }
  0x4b   :  { %114 = vrot.lane.b32.xlu0 %v927_v0, %s911_s12 }
  0x81   :  { %v25_v1 = vpop.permute.xlu0 %24  ;;  %v31_v2 = vpop.permute.xlu1 %30 }
  0x82   :  { %v137_v14 = vcombine.low %v927_v0, %v25_v1  ;;  %v26_v34 = vrot.slane %v25_v1, 1  ;;  %v118_v35 = vrot.slane %v25_v1, 2  ;;  %v32_v36 = vrot.slane %v31_v2, 1 }
  0x83   :  { %v120_v38 = vrot.slane %v31_v2, 2 }
  0x84   :  { %v147_v19 = vrot.slane %v137_v14, %v970_v13  ;;  %v333_v45 = vcombine.low %v23_v31, %v26_v34  ;;  %v529_v47 = vcombine.low %v117_v32, %v118_v35 }
  0x85   :  { %v28_v6 = vpop.permute.xlu0 %27  ;;  %v960_v7 = vpop.permute.xlu1 %33 }
  0x86   :  { %v138_v10 = vcombine.low %v28_v6, %v31_v2  ;;  %v29_v37 = vrot.slane %v28_v6, 1  ;;  %v119_v39 = vrot.slane %v28_v6, 2  ;;  %v35_v53 = vrot.slane %v960_v7, 1 }
  0x87   :  { %v121_v54 = vrot.slane %v960_v7, 2 }
  0x88   :  { %v154_v15 = vrot.slane %v138_v10, %v970_v13  ;;  %v334_v46 = vcombine.low %v29_v37, %v32_v36  ;;  %v530_v48 = vcombine.low %v119_v39, %v120_v38  ;;  %v539_v10 = vrot.slane %v529_v47, %v970_v13 }
  0x89   :  { %v965_v11 = vpop.permute.xlu0 %36  ;;  %v967_v12 = vpop.permute.xlu1 %39 }
  0x8a   :  { %v139_v16 = vcombine.low %v960_v7, %v965_v11  ;;  %v169_v25 = vcombine.low %v147_v19, %v154_v15  ;;  %v41_v55 = vrot.slane %v967_v12, 1  ;;  %v38_v57 = vrot.slane %v965_v11, 1 }
  0x8b   :  { %v122_v58 = vrot.slane %v965_v11, 2  ;;  %v350_v61 = vrot.slane %v334_v46, %v970_v13  ;;  %v123_v62 = vrot.slane %v967_v12, 2  ;;  %v546_v0 = vrot.slane %v530_v48, %v970_v13 }
  0x8c   :  { %v161_v21 = vrot.slane %v139_v16, %v970_v13  ;;  %v177_v29 = vrot.slane %v169_v25, %v970_v13  ;;  %v343_v7 = vrot.slane %v333_v45, %v970_v13  ;;  %v335_v11 = vcombine.low %v35_v53, %v38_v57 }
  0x8d   :  { %v43_v17 = vpop.permute.xlu0 %42  ;;  %v976_v18 = vpop.permute.xlu1 %45  ;;  %v531_v14 = vcombine.low %v121_v54, %v122_v58 }
  0x8e   :  { %v140_v20 = vcombine.low %v967_v12, %v43_v17  ;;  %v44_v56 = vrot.slane %v43_v17, 1  ;;  %v124_v63 = vrot.slane %v43_v17, 2  ;;  %v47_v16 = vrot.slane %v976_v18, 1 }
  0x8f   :  { %v1031_v19 = vcombine.low %v343_v7, %v350_v61  ;;  %v553_v31 = vrot.slane %v531_v14, %v970_v13  ;;  %v125_v34 = vrot.slane %v976_v18, 2 }
  0x90   :  { %v168_v22 = vrot.slane %v140_v20, %v970_v13  ;;  %v336_v8 = vcombine.low %v41_v55, %v44_v56  ;;  %v532_v15 = vcombine.low %v123_v62, %v124_v63 }
  0x91   :  { %v982_v23 = vpop.permute.xlu0 %48  ;;  %v984_v24 = vpop.permute.xlu1 %51  ;;  %v373_v36 = vrot.slane %v1031_v19, %v970_v13 }
  0x92   :  { %v170_v26 = vcombine.low %v161_v21, %v168_v22  ;;  %v186_v44 = vcombine.low %v976_v18, %v982_v23  ;;  %v50_v17 = vrot.slane %v982_v23, 1  ;;  %v126_v37 = vrot.slane %v982_v23, 2 }
  0x93   :  { %v53_v45 = vrot.slane %v984_v24, 1  ;;  %v127_v46 = vrot.slane %v984_v24, 2 }
  0x94   :  { %v184_v30 = vrot.slane %v170_v26, %v970_v13  ;;  %v196_v59 = vrot.slane %v186_v44, %v970_v13  ;;  %v1037_v26 = vcombine.low %v539_v10, %v546_v0  ;;  %v1044_v35 = vcombine.low %v47_v16, %v50_v17 }
  0x95   :  { %v986_v27 = vpop.permute.xlu0 %54  ;;  %v988_v28 = vpop.permute.xlu1 %57 }
  0x96   :  { %v185_v33 = vcombine.low %v177_v29, %v184_v30  ;;  %v187_v40 = vcombine.low %v984_v24, %v986_v27  ;;  %v364_v29 = vrot.slane %v336_v8, %v970_v13  ;;  %v357_v30 = vrot.slane %v335_v11, %v970_v13 }
  0x97   :  { %v569_v44 = vrot.slane %v1037_v26, %v970_v13  ;;  %v392_v55 = vrot.slane %v1044_v35, %v970_v13  ;;  %v56_v24 = vrot.slane %v986_v27, 1  ;;  %v128_v0 = vrot.slane %v986_v27, 2 }
  0x98   :  { %v663_v41 = vsel %vm662_vm0, %v185_v33, -inf  ;;  %v203_v49 = vrot.slane %v187_v40, %v970_v13  ;;  %v560_v33 = vrot.slane %v532_v15, %v970_v13  ;;  %v1058_v48 = vcombine.low %v357_v30, %v364_v29 }
  0x99   :  { %v997_v42 = vpop.permute.xlu0 %60  ;;  %v999_v43 = vpop.permute.xlu1 %63  ;;  %664 = vmax.xlane.f32.xlu1 %v663_v41  ;;  %v1079_v17 = vcombine.low %v53_v45, %v56_v24  ;;  %v129_v27 = vrot.slane %v988_v28, 2 }
  0x9a   :  { %v188_v50 = vcombine.low %v988_v28, %v997_v42  ;;  %v218_v6 = vcombine.low %v196_v59, %v203_v49  ;;  %v1064_v58 = vcombine.low %v553_v31, %v560_v33  ;;  %v65_v7 = vrot.slane %v999_v43, 1 }
  0x9b   :  { %v62_v30 = vrot.slane %v997_v42, 1  ;;  %v130_v31 = vrot.slane %v997_v42, 2 }
  0x9c   :  { %v210_v1 = vrot.slane %v188_v50, %v970_v13  ;;  %v226_v22 = vrot.slane %v218_v6, %v970_v13  ;;  %v576_v42 = vrot.slane %v1064_v58, %v970_v13 }
  0x9d   :  { %v1006_v51 = vpop.permute.xlu0 %66  ;;  %v1008_v52 = vpop.permute.xlu1 %69  ;;  %v1102_v24 = vcombine.low %v129_v27, %v130_v31 }
  0x9e   :  { %v189_v60 = vcombine.low %v999_v43, %v1006_v51  ;;  %v71_v59 = vrot.slane %v1008_v52, 1  ;;  %v68_v14 = vrot.slane %v1006_v51, 1 }
  0x9f   :  { %v602_v18 = vrot.slane %v1102_v24, %v970_v13 }
  0xa0   :  { %v217_v2 = vrot.slane %v189_v60, %v970_v13 }
  0xa1   :  { %v1023_v3 = vpop.permute.xlu0 %72  ;;  %v1025_v4 = vpop.permute.xlu1 %75 }
  0xa2   :  { %v219_v12 = vcombine.low %v210_v1, %v217_v2  ;;  %v235_v47 = vcombine.low %v1008_v52, %v1023_v3  ;;  %v77_v49 = vrot.slane %v1025_v4, 1  ;;  %v74_v60 = vrot.slane %v1023_v3, 1 }
  0xa3   :  { %v59_v1 = vrot.slane %v988_v28, 1  ;;  %v380_v28 = vrot.slane %v1058_v48, %v970_v13  ;;  %v135_v45 = vrot.slane %v1025_v4, 2  ;;  %v399_v48 = vrot.slane %v1079_v17, %v970_v13 }
  0xa4   :  { %v233_v25 = vrot.slane %v219_v12, %v970_v13  ;;  %v245_v8 = vrot.slane %v235_v47, %v970_v13  ;;  %v134_v58 = vrot.slane %v1023_v3, 2 }
  0xa5   :  { %v1033_v20 = vpop.permute.xlu0 %78  ;;  %v82_v21 = vpop.permute.xlu1 %81 }
  0xa6   :  { %v234_v32 = vcombine.low %v226_v22, %v233_v25  ;;  %v236_v38 = vcombine.low %v1025_v4, %v1033_v20  ;;  %v80_v50 = vrot.slane %v1033_v20, 1  ;;  %v83_v53 = vrot.slane %v82_v21, 1 }
  0xa7   :  { %v131_v4 = vrot.slane %v999_v43, 2 }
  0xa8   :  { %v666_v39 = vsel %vm662_vm0, %v234_v32, -inf  ;;  %v252_v61 = vrot.slane %v236_v38, %v970_v13  ;;  %v432_v10 = vcombine.low %v77_v49, %v80_v50  ;;  %v1087_v38 = vcombine.low %v127_v46, %v128_v0 }
  0xa9   :  { %v85_v40 = vpop.permute.xlu0 %84  ;;  %v88_v41 = vpop.permute.xlu1 %87  ;;  %667 = vmax.xlane.f32.xlu0 %v666_v39  ;;  %v136_v46 = vrot.slane %v1033_v20, 2  ;;  %v132_v20 = vrot.slane %v1006_v51, 2 }
  0xaa   :  { %v86_v54 = vrot.slane %v85_v40, 1  ;;  %v237_v56 = vcombine.low %v82_v21, %v85_v40  ;;  %v89_v57 = vrot.slane %v88_v41, 1  ;;  %v431_v21 = vcombine.low %v71_v59, %v74_v60 }
  0xab   :  { %v267_v29 = vcombine.low %v245_v8, %v252_v61  ;;  %v448_v39 = vrot.slane %v432_v10, %v970_v13  ;;  %v133_v59 = vrot.slane %v1008_v52, 2 }
  0xac   :  { %v433_v11 = vcombine.low %v83_v53, %v86_v54  ;;  %v259_v12 = vrot.slane %v237_v56, %v970_v13  ;;  %v441_v49 = vrot.slane %v431_v21, %v970_v13 }
  0xad   :  { %v91_v62 = vpop.permute.xlu0 %90  ;;  %v1070_v63 = vpop.permute.xlu1 %93  ;;  %v275_v54 = vrot.slane %v267_v29, %v970_v13 }
  0xae   :  { %v92_v2 = vrot.slane %v91_v62, 1  ;;  %v238_v6 = vcombine.low %v88_v41, %v91_v62  ;;  %v455_v40 = vrot.slane %v433_v11, %v970_v13  ;;  %v385_v41 = vcombine.low %v65_v7, %v68_v14 }
  0xaf   :  { %v463_v61 = vcombine.low %v441_v49, %v448_v39  ;;  %v627_v14 = vcombine.low %v133_v59, %v134_v58  ;;  %v581_v39 = vcombine.low %v131_v4, %v132_v20 }
  0xb0   :  { %v266_v15 = vrot.slane %v238_v6, %v970_v13  ;;  %v434_v16 = vcombine.low %v89_v57, %v92_v2  ;;  %v384_v57 = vcombine.low %v59_v1, %v62_v30  ;;  %v413_v62 = vrot.slane %v385_v41, %v970_v13 }
  0xb1   :  { %v1082_v22 = vpop.permute.xlu0 %96  ;;  %v100_v25 = vpop.permute.xlu1 %99  ;;  %v381_v2 = vcombine.low %v373_v36, %v380_v28  ;;  %v628_v1 = vcombine.low %v135_v45, %v136_v46  ;;  %v471_v36 = vrot.slane %v463_v61, %v970_v13  ;;  %v635_v28 = vrot.slane %v627_v14, %v970_v13 }
  0xb2   :  { %v268_v32 = vcombine.low %v259_v12, %v266_v15  ;;  %v462_v33 = vrot.slane %v434_v16, %v970_v13  ;;  %v284_v6 = vcombine.low %v1070_v63, %v1082_v22  ;;  %v101_v8 = vrot.slane %v100_v25, 1 }
  0xb3   :  { %v95_v12 = vrot.slane %v1070_v63, 1  ;;  %v98_v19 = vrot.slane %v1082_v22, 1  ;;  %v406_v15 = vrot.slane %v384_v57, %v970_v13  ;;  %v675_v29 = vsel %vm662_vm0, %v381_v2, -inf }
  0xb4   :  { %v282_v47 = vrot.slane %v268_v32, %v970_v13  ;;  %v464_v56 = vcombine.low %v455_v40, %v462_v33  ;;  %v294_v21 = vrot.slane %v284_v6, %v970_v13  ;;  %v642_v31 = vrot.slane %v628_v1, %v970_v13 }
  0xb5   :  { %v103_v50 = vpop.permute.xlu0 %102  ;;  %v106_v53 = vpop.permute.xlu1 %105  ;;  %v480_v40 = vcombine.low %v95_v12, %v98_v19  ;;  %v415_v41 = vcombine.low %v406_v15, %v413_v62  ;;  %v609_v26 = vrot.slane %v581_v39, %v970_v13  ;;  %v595_v61 = vrot.slane %v1087_v38, %v970_v13 }
  0xb6   :  { %v283_v60 = vcombine.low %v275_v54, %v282_v47  ;;  %v285_v0 = vcombine.low %v100_v25, %v103_v50  ;;  %v478_v3 = vrot.slane %v464_v56, %v970_v13  ;;  %v104_v10 = vrot.slane %v103_v50, 1 }
  0xb7   :  { %v107_v51 = vrot.slane %v106_v53, 1  ;;  %v643_v54 = vcombine.low %v635_v28, %v642_v31  ;;  %v414_v56 = vcombine.low %v392_v55, %v399_v48  ;;  %v490_v35 = vrot.slane %v480_v40, %v970_v13 }
  0xb8   :  { %v669_v43 = vsel %vm662_vm0, %v283_v60, -inf  ;;  %v301_v16 = vrot.slane %v285_v0, %v970_v13  ;;  %v479_v30 = vcombine.low %v471_v36, %v478_v3  ;;  %v481_v32 = vcombine.low %v101_v8, %v104_v10 }
  0xb9   :  { %v109_v52 = vpop.permute.xlu0 %108  ;;  %v112_v7 = vpop.permute.xlu1 %111  ;;  %670 = vmax.xlane.f32.xlu0 %v669_v43  ;;  %v578_v60 = vcombine.low %v125_v34, %v126_v37  ;;  %v650_v23 = vrot.slane %v643_v54, %v970_v13  ;;  %v422_v37 = vrot.slane %v414_v56, %v970_v13  ;;  %v611_v6 = vcombine.low %v602_v18, %v609_v26 }
  0xba   :  { %v110_v11 = vrot.slane %v109_v52, 1  ;;  %v286_v17 = vcombine.low %v106_v53, %v109_v52  ;;  %v113_v27 = vrot.slane %v112_v7, 1  ;;  %v316_v45 = vcombine.low %v294_v21, %v301_v16 }
  0xbb   :  { %v681_v50 = vsel %vm662_vm0, %v479_v30, -inf  ;;  %v577_v53 = vcombine.low %v569_v44, %v576_v42  ;;  %v497_v57 = vrot.slane %v481_v32, %v970_v13  ;;  %v429_v44 = vrot.slane %v415_v41, %v970_v13 }
  0xbc   :  { %v482_v63 = vcombine.low %v107_v51, %v110_v11  ;;  %v308_v47 = vrot.slane %v286_v17, %v970_v13  ;;  %v324_v55 = vrot.slane %v316_v45, %v970_v13  ;;  %v588_v0 = vrot.slane %v578_v60, %v970_v13 }
  0xbd   :  { %v115_v25 = vpop.permute.xlu0 %114  ;;  %676 = vmax.xlane.f32.xlu0 %v675_v29  ;;  %v687_v20 = vsel %vm662_vm0, %v577_v53, -inf  ;;  %v512_v62 = vcombine.low %v490_v35, %v497_v57  ;;  %v430_v1 = vcombine.low %v422_v37, %v429_v44  ;;  %v694_v43 = vsel %vm693_vm1, %v650_v23, -inf }
  0xbe   :  { %v116_v33 = vrot.slane %v115_v25, 1  ;;  %v287_v22 = vcombine.low %v112_v7, %v115_v25  ;;  %v504_v4 = vrot.slane %v482_v63, %v970_v13  ;;  %v610_v7 = vcombine.low %v588_v0, %v595_v61 }
  0xbf   :  { %v520_v52 = vrot.slane %v512_v62, %v970_v13  ;;  %v678_v24 = vsel %vm662_vm0, %v430_v1, -inf  ;;  %v625_v8 = vrot.slane %v611_v6, %v970_v13  ;;  %v709_v19 = vand.u32 127, %v144_v5 }
  0xc0   :  { %v315_v49 = vrot.slane %v287_v22, %v970_v13  ;;  %v483_v46 = vcombine.low %v113_v27, %v116_v33  ;;  %v618_v10 = vrot.slane %v610_v7, %v970_v13 }
  0xc1   :  { %682 = vmax.xlane.f32.xlu0 %v681_v50  ;;  %v714_v15 = vadd.s32 4294967288, %v709_v19  ;;  %v721_v16 = vadd.s32 4294967280, %v709_v19  ;;  %v728_v21 = vadd.s32 4294967272, %v709_v19  ;;  %v735_v30 = vadd.s32 4294967264, %v709_v19 }
  0xc2   :  { %v317_v59 = vcombine.low %v308_v47, %v315_v49  ;;  %v511_v58 = vrot.slane %v483_v46, %v970_v13  ;;  %v626_v11 = vcombine.low %v618_v10, %v625_v8  ;;  %v742_v63 = vadd.s32 4294967256, %v709_v19 }
  0xc3   :  { %v717_v17 = vsub.s32 %v714_v15, %v963_v9  ;;  %v724_v25 = vsub.s32 %v721_v16, %v963_v9  ;;  %v731_v32 = vsub.s32 %v728_v21, %v963_v9  ;;  %v738_v39 = vsub.s32 %v735_v30, %v963_v9 }
  0xc4   :  { %v331_v42 = vrot.slane %v317_v59, %v970_v13  ;;  %v513_v48 = vcombine.low %v504_v4, %v511_v58  ;;  %v690_v14 = vsel %vm662_vm0, %v626_v11, -inf  ;;  %v749_v40 = vadd.s32 4294967248, %v709_v19 }
  0xc5   :  { %688 = vmax.xlane.f32.xlu0 %v687_v20  ;;  %v745_v47 = vsub.s32 %v742_v63, %v963_v9  ;;  %v756_v49 = vadd.s32 4294967240, %v709_v19  ;;  %v763_v56 = vadd.s32 4294967232, %v709_v19  ;;  %v770_v60 = vadd.s32 4294967224, %v709_v19 }
  0xc6   :  { %v332_v34 = vcombine.low %v324_v55, %v331_v42  ;;  %v527_v38 = vrot.slane %v513_v48, %v970_v13  ;;  %v712_v13 = vsub.s32 %v709_v19, %v963_v9  ;;  %v752_v54 = vsub.s32 %v749_v40, %v963_v9 }
  0xc7   :  { %v759_v58 = vsub.s32 %v756_v49, %v963_v9  ;;  %v777_v26 = vadd.s32 4294967216, %v709_v19  ;;  %v766_v42 = vsub.s32 %v763_v56, %v963_v9  ;;  %v773_v20 = vsub.s32 %v770_v60, %v963_v9 }
  0xc8   :  { %v672_v2 = vsel %vm662_vm0, %v332_v34, -inf  ;;  %v528_v3 = vcombine.low %v520_v52, %v527_v38 }
  0xc9   :  { %673 = vmax.xlane.f32.xlu1 %v672_v2  ;;  %695 = vmax.xlane.f32.xlu0 %v694_v43  ;;  %v780_v23 = vsub.s32 %v777_v26, %v963_v9 }
  0xca   :  { %v684_v51 = vsel %vm662_vm0, %v528_v3, -inf }
  0xcd   :  { %679 = vmax.xlane.f32.xlu1 %v678_v24 }
  0xd1   :  { %685 = vmax.xlane.f32.xlu1 %v684_v51 }
  0xd5   :  { %691 = vmax.xlane.f32.xlu1 %v690_v14 }
 0x122   :  { %v665_v29 = vpop.xlane.xlu1 %664 }
 0x123   :  { %v713_v5 = vrot.slane %v665_v29, %v712_v13 }
 0x132   :  { %v668_v12 = vpop.xlane.xlu0 %667 }
 0x133   :  { %v718_v31 = vrot.slane %v668_v12, %v717_v17 }
 0x135   :  { %v720_v41 = vsel %vm719_vm2, %v718_v31, %v713_v5 }
 0x142   :  { %v671_v36 = vpop.xlane.xlu0 %670 }
 0x143   :  { %v725_v33 = vrot.slane %v671_v36, %v724_v25 }
 0x145   :  { %v727_v46 = vsel %vm726_vm3, %v725_v33, %v720_v41 }
 0x146   :  { %v677_v27 = vpop.xlane.xlu0 %676 }
 0x147   :  { %v739_v53 = vrot.slane %v677_v27, %v738_v39 }
 0x14a   :  { %v683_v22 = vpop.xlane.xlu0 %682 }
 0x14b   :  { %v753_v55 = vrot.slane %v683_v22, %v752_v54 }
 0x14e   :  { %v689_v4 = vpop.xlane.xlu0 %688 }
 0x14f   :  { %v767_v62 = vrot.slane %v689_v4, %v766_v42 }
 0x152   :  { %v674_v28 = vpop.xlane.xlu1 %673  ;;  %v696_v34 = vpop.xlane.xlu0 %695 }
 0x153   :  { %v732_v45 = vrot.slane %v674_v28, %v731_v32  ;;  %v781_v1 = vrot.slane %v696_v34, %v780_v23 }
 0x155   :  { %v734_v50 = vsel %vm733_vm4, %v732_v45, %v727_v46 }
 0x156   :  { %v680_v57 = vpop.xlane.xlu1 %679  ;;  %v741_v44 = vsel %vm740_vm5, %v739_v53, %v734_v50 }
 0x157   :  { %v746_v59 = vrot.slane %v680_v57, %v745_v47 }
 0x159   :  { %v748_v35 = vsel %vm747_vm6, %v746_v59, %v741_v44 }
 0x15a   :  { %v686_v48 = vpop.xlane.xlu1 %685  ;;  %v755_v18 = vsel %vm754_vm7, %v753_v55, %v748_v35 }
 0x15b   :  { %v760_v61 = vrot.slane %v686_v48, %v759_v58 }
 0x15d   :  { %v762_v37 = vsel %vm761_vm8, %v760_v61, %v755_v18 }
 0x15e   :  { %v692_v0 = vpop.xlane.xlu1 %691  ;;  %v769_v38 = vsel %vm768_vm9, %v767_v62, %v762_v37 }
 0x15f   :  { %v774_v2 = vrot.slane %v692_v0, %v773_v20 }
 0x161   :  { %v776_v6 = vsel %vm775_vm10, %v774_v2, %v769_v38 }
 0x162   :  { %v783_v43 = vsel %vm782_vm11, %v781_v1, %v776_v6 }
 0x163   :  { %786 = vst.msk [vmem:[#allocation5] sm:$0x1] %vm785_vm12, %v783_v43 }
 0x164   :  { %867 = shalt.err (!%p864_p9)
}
 0x165   :  { %796 = dma.vmem_to_hbm [thread:$0]  %s794_s14, 16, %s1178_s1, [#allocation4]  }
 0x166   :  { %878 = dma.done.wait [#allocation4], 16  }
 0x167   :  { %879 = vsyncadd [#allocation4], 4294967280 }
 0x168   :  { %800 = vsyncpa [#allocation3], 1 }
 0x169   :  { %801 = vsyncpa [#allocation4], 1 }

</bundles_post_ra>
